<compile_context>
chip_gen: v7x
topology: tpu7x:2x2x1
jax: 0.10.0
libtpu: 0.0.40
codegen_flags: <defaults>
</compile_context>

<pallas_src>
import functools

import jax
import jax.numpy as jnp
from jax import lax
from jax.experimental import pallas as pl
from jax.experimental.pallas import tpu as pltpu

LANE = 128  # TPU vreg lane width


def _channel_attention_kernel(x_ref, w1t_ref, w2t_ref, out_ref,
                              sum_acc, max_acc, *, hw, tile_hw, chunk_w,
                              last_full_chunks, last_tail_valid, mask_needed):
    # x_ref  : (n_tile, C, tile_hw)   input slab for this (batch, hw) grid step
    # w1t_ref: (C, C_mid)             fc1 weight, pre-transposed (resident)
    # w2t_ref: (C_mid, C)             fc2 weight, pre-transposed (resident)
    # out_ref: (1, n_tile, C)         sigmoid attention map
    # sum_acc/max_acc: (n_tile, C) f32 running reductions
    hw_idx = pl.program_id(1)
    last = pl.num_programs(1) - 1
    n_chunks = tile_hw // chunk_w

    @pl.when(hw_idx == 0)
    def _init():
        sum_acc[...] = jnp.zeros_like(sum_acc)
        max_acc[...] = jnp.full_like(max_acc, -jnp.inf)

    def accum_chunk(carry, off):
        # Load one lane chunk and reduce it cross-lane (XLU) into the small carry.
        s, m = carry
        chunk = x_ref[:, :, pl.ds(off, chunk_w)].astype(jnp.float32)
        s = s + jnp.sum(chunk, axis=-1)
        m = jnp.maximum(m, jnp.max(chunk, axis=-1))
        return s, m

    def accumulate(n_full, tail_valid):
        # n_full: static number of fully-valid chunks; tail_valid: static number
        # of valid lanes in the single straddling chunk (0 => none).
        carry = (sum_acc[...], max_acc[...])
        if 0 < n_full <= 8:
            for j in range(n_full):            # short trip count: full unroll
                carry = accum_chunk(carry, j * chunk_w)
        elif n_full > 8:
            carry = lax.fori_loop(
                0, n_full,
                lambda j, c: accum_chunk(c, pl.multiple_of(j * chunk_w, chunk_w)),
                carry, unroll=4)
        s, m = carry
        if tail_valid:
            off = n_full * chunk_w
            chunk = x_ref[:, :, pl.ds(off, chunk_w)].astype(jnp.float32)
            # Zero padding makes the sum exact with no mask.
            s = s + jnp.sum(chunk, axis=-1)
            # Mask only the max branch, only on this one chunk; iota built once.
            lane = lax.broadcasted_iota(jnp.int32, (1, 1, chunk_w), 2)
            neg = jnp.where(lane < tail_valid, 0.0, -jnp.inf)
            m = jnp.maximum(m, jnp.max(chunk + neg, axis=-1))
        sum_acc[...] = s
        max_acc[...] = m

    if mask_needed:
        @pl.when(hw_idx != last)
        def _hot():
            accumulate(n_chunks, 0)

        @pl.when(hw_idx == last)
        def _ragged():
            accumulate(last_full_chunks, last_tail_valid)
    else:
        accumulate(n_chunks, 0)

    @pl.when(hw_idx == last)
    def _finalize():
        avg_p = sum_acc[...] * (1.0 / hw)     # (n_tile, C), true-HW divisor
        max_p = max_acc[...]                  # (n_tile, C)

        def mlp(p):
            h = jnp.dot(p, w1t_ref[...], preferred_element_type=jnp.float32)
            h = jnp.maximum(h, 0.0)           # ReLU
            return jnp.dot(h, w2t_ref[...], preferred_element_type=jnp.float32)

        out = mlp(avg_p) + mlp(max_p)
        out_ref[...] = jax.nn.sigmoid(out).reshape(out_ref.shape).astype(out_ref.dtype)


def channel_attention(x, w1, w2, *, tile_hw=None, block_bytes=8 * 1024 * 1024,
                      vmem_limit_bytes=48 * 1024 * 1024):
    """x: (N, C, H, W); w1: (C_mid, C, 1, 1); w2: (C, C_mid, 1, 1).

    Returns (N, C, 1, 1) sigmoid channel-attention map, matching PyTorch
    ChannelAttention.forward (no-bias 1x1 convs, ratio hardcoded 16).
    """
    N, C, H, W = x.shape
    C_mid = w1.shape[0]
    HW = H * W
    itemsize = jnp.dtype(x.dtype).itemsize

    hw_lane_pad = -(-HW // LANE) * LANE

    # --- Batch tiling: n_tile=1 unless the per-batch slab is tiny; always keep
    #     >= 2 batch blocks when N >= 2 (megacore / both v7x TensorCores), and
    #     cap rows per block so the per-chunk live set stays small.
    bytes_per_batch = C * hw_lane_pad * itemsize
    n_tile = 1
    if bytes_per_batch < 512 * 1024:
        n_tile = max(1, (512 * 1024) // max(bytes_per_batch, 1))
    if N >= 2:
        n_tile = min(n_tile, -(-N // 2))
    n_tile = max(1, min(n_tile, N, max(1, 256 // C)))
    n_grid = -(-N // n_tile)
    N_pad = n_grid * n_tile

    # --- HW tiling: lane-aligned, ~block_bytes per x block (2 buffers + tiny
    #     scratch/weights sit comfortably under the 48 MiB limit on all gens).
    if tile_hw is None:
        bytes_per_lane_col = n_tile * C * itemsize
        max_tile = max(LANE, (block_bytes // bytes_per_lane_col) // LANE * LANE)
        tile_hw = min(hw_lane_pad, max_tile)
    assert tile_hw % LANE == 0
    hw_grid = -(-HW // tile_hw)
    HW_pad = hw_grid * tile_hw
    rem = HW - (hw_grid - 1) * tile_hw          # valid lanes in the last tile
    mask_needed = rem != tile_hw

    # --- Lane-chunk width for the in-kernel reduce loop: keep the live chunk
    #     around <=64 KiB of f32; must divide tile_hw (128 always does).
    target_chunk = max(LANE, (64 * 1024) // max(n_tile * C * 4, 1))
    chunk_w = LANE
    for cand in (512, 384, 256, 128):
        if cand <= target_chunk and tile_hw % cand == 0:
            chunk_w = cand
            break
    last_full_chunks = rem // chunk_w
    last_tail_valid = rem % chunk_w

    x_flat = x.reshape(N, C, HW)
    if N_pad != N or HW_pad != HW:
        x_flat = jnp.pad(x_flat, ((0, N_pad - N), (0, 0), (0, HW_pad - HW)))

    # Pre-transpose the 1x1-conv weights once in the wrapper (no in-kernel .T).
    w1_t = w1.reshape(C_mid, C).T.astype(jnp.float32)   # (C, C_mid)
    w2_t = w2.reshape(C, C_mid).T.astype(jnp.float32)   # (C_mid, C)

    kernel = functools.partial(
        _channel_attention_kernel, hw=HW, tile_hw=tile_hw, chunk_w=chunk_w,
        last_full_chunks=last_full_chunks, last_tail_valid=last_tail_valid,
        mask_needed=mask_needed)

    cost = pl.CostEstimate(
        flops=2 * N_pad * C * HW_pad               # streaming sum + max
        + 2 * (2 * N_pad) * C * C_mid * 2,         # two tiny matmuls x 2 branches
        transcendentals=N_pad * C,                 # sigmoid
        bytes_accessed=N_pad * C * HW_pad * itemsize
        + 2 * C * C_mid * 4 + N_pad * C * itemsize,
    )

    out = pl.pallas_call(
        kernel,
        out_shape=jax.ShapeDtypeStruct((n_grid, n_tile, C), x.dtype),
        grid_spec=pltpu.PrefetchScalarGridSpec(
            num_scalar_prefetch=0,
            grid=(n_grid, hw_grid),
            in_specs=[
                pl.BlockSpec((n_tile, C, tile_hw), lambda b, h: (b, 0, h)),
                pl.BlockSpec((C, C_mid), lambda b, h: (0, 0)),
                pl.BlockSpec((C_mid, C), lambda b, h: (0, 0)),
            ],
            out_specs=pl.BlockSpec((1, n_tile, C), lambda b, h: (b, 0, 0)),
            scratch_shapes=[
                pltpu.VMEM((n_tile, C), jnp.float32),   # running sums
                pltpu.VMEM((n_tile, C), jnp.float32),   # running maxes
            ],
        ),
        compiler_params=pltpu.CompilerParams(
            dimension_semantics=("parallel", "arbitrary"),
            vmem_limit_bytes=vmem_limit_bytes,
        ),
        cost_estimate=cost,
    )(x_flat, w1_t, w2_t)

    return out.reshape(N_pad, C)[:N].reshape(N, C, 1, 1)


def _reference(x, w1, w2):
    N, C, H, W = x.shape
    C_mid = w1.shape[0]
    w1m = w1.reshape(C_mid, C)
    w2m = w2.reshape(C, C_mid)
    avg_p = jnp.mean(x, axis=(2, 3))
    max_p = jnp.max(x, axis=(2, 3))

    def mlp(p):
        return jnp.maximum(p @ w1m.T, 0.0) @ w2m.T

    return jax.nn.sigmoid(mlp(avg_p) + mlp(max_p)).reshape(N, C, 1, 1)


if __name__ == "__main__":
    key = jax.random.PRNGKey(0)

    # in_planes must be >= 16 because the module hardcodes // 16.
    N, C = 2, 32
    C_mid = C // 16
    kx, k1, k2 = jax.random.split(key, 3)
    w1 = jax.random.normal(k1, (C_mid, C, 1, 1), dtype=jnp.float32) * (2.0 / C) ** 0.5
    w2 = jax.random.normal(k2, (C, C_mid, 1, 1), dtype=jnp.float32) * (2.0 / C_mid) ** 0.5

    # Case 1: small, evenly lane-tiled spatial extent (single HW tile).
    H, W = 16, 16
    x = jax.random.normal(kx, (N, C, H, W), dtype=jnp.float32)
    out = channel_attention(x, w1, w2)
    jax.block_until_ready(out)
    ref = _reference(x, w1, w2)
    assert out.shape == (N, C, 1, 1)
    assert jnp.allclose(out, ref, atol=1e-5, rtol=1e-5), "mismatch (case 1)"

    # Case 2: multi-tile HW reduction with a ragged (masked) last tile.
    H2, W2 = 17, 17   # HW = 289: 3 tiles of 128, last one partially filled
    x2 = jax.random.normal(jax.random.fold_in(key, 7), (N, C, H2, W2),
                           dtype=jnp.float32)
    out2 = channel_attention(x2, w1, w2, tile_hw=128)
    jax.block_until_ready(out2)
    ref2 = _reference(x2, w1, w2)
    assert jnp.allclose(out2, ref2, atol=1e-5, rtol=1e-5), "mismatch (case 2)"

    # Case 3: larger spatial extent exercising the fori_loop chunk path and
    # the lane-masked straddling chunk (HW=4624, 36 full 128-chunks + tail 16).
    H3, W3 = 68, 68
    x3 = jax.random.normal(jax.random.fold_in(key, 11), (N, C, H3, W3),
                           dtype=jnp.float32)
    out3 = channel_attention(x3, w1, w2)
    jax.block_until_ready(out3)
    ref3 = _reference(x3, w1, w2)
    assert jnp.allclose(out3, ref3, atol=1e-5, rtol=1e-5), "mismatch (case 3)"

    print("KERNEL_OK")
</pallas_src>

<mosaic_0001>
module attributes {stable_mosaic.version = 11 : i64} {
  func.func @_channel_attention_kernel(%arg0: i32, %arg1: i32, %arg2: memref<1x32x256xf32, #tpu.memory_space<vmem>>, %arg3: memref<32x2xf32, #tpu.memory_space<vmem>>, %arg4: memref<2x32xf32, #tpu.memory_space<vmem>>, %arg5: memref<1x1x32xf32, #tpu.memory_space<vmem>>, %arg6: memref<1x32xf32, #tpu.memory_space<vmem>>, %arg7: memref<1x32xf32, #tpu.memory_space<vmem>>) attributes {dimension_semantics = [#tpu.dimension_semantics<parallel>, #tpu.dimension_semantics<arbitrary>], iteration_bounds = array<i64: 2, 1>, scalar_prefetch = 0 : i64, scratch_operands = 2 : i64, tpu.core_type = #tpu.core_type<tc>, window_params = [{transform_indices = @transform_0, window_bounds = array<i64: 1, 32, 256>}, {pipeline_mode = #tpu.pipeline_mode<synchronous>, transform_indices = @transform_1, window_bounds = array<i64: 32, 2>}, {pipeline_mode = #tpu.pipeline_mode<synchronous>, transform_indices = @transform_2, window_bounds = array<i64: 2, 32>}, {transform_indices = @transform_3, window_bounds = array<i64: 1, 1, 32>}]} {
    %c0_i32 = arith.constant 0 : i32
    %0 = arith.cmpi eq, %arg1, %c0_i32 : i32
    %1 = arith.extui %0 : i1 to i32
    %c0_i32_0 = arith.constant 0 : i32
    %2 = arith.cmpi ne, %1, %c0_i32_0 : i32
    scf.if %2 {
      %cst_14 = arith.constant 0.000000e+00 : f32
      %15 = vector.broadcast %cst_14 : f32 to vector<1x32xf32>
      %c0_15 = arith.constant 0 : index
      %c0_16 = arith.constant 0 : index
      %16 = vector.load %arg6[%c0_15, %c0_16] : memref<1x32xf32, #tpu.memory_space<vmem>>, vector<1x32xf32>
      tpu.vector_store %arg6[%c0_15, %c0_16], %15 {strides = array<i32>} : memref<1x32xf32, #tpu.memory_space<vmem>>, vector<1x32xf32>,
      %cst_17 = arith.constant 0xFF800000 : f32
      %17 = vector.broadcast %cst_17 : f32 to vector<1x32xf32>
      %c0_18 = arith.constant 0 : index
      %c0_19 = arith.constant 0 : index
      %18 = vector.load %arg7[%c0_18, %c0_19] : memref<1x32xf32, #tpu.memory_space<vmem>>, vector<1x32xf32>
      tpu.vector_store %arg7[%c0_18, %c0_19], %17 {strides = array<i32>} : memref<1x32xf32, #tpu.memory_space<vmem>>, vector<1x32xf32>,
    } else {
    }
    %c0 = arith.constant 0 : index
    %c0_1 = arith.constant 0 : index
    %3 = vector.load %arg6[%c0, %c0_1] : memref<1x32xf32, #tpu.memory_space<vmem>>, vector<1x32xf32>
    %c0_2 = arith.constant 0 : index
    %c0_3 = arith.constant 0 : index
    %4 = vector.load %arg7[%c0_2, %c0_3] : memref<1x32xf32, #tpu.memory_space<vmem>>, vector<1x32xf32>
    %c0_4 = arith.constant 0 : index
    %c0_5 = arith.constant 0 : index
    %c0_6 = arith.constant 0 : index
    %5 = vector.load %arg2[%c0_4, %c0_5, %c0_6] : memref<1x32x256xf32, #tpu.memory_space<vmem>>, vector<1x32x256xf32>
    %cst = arith.constant dense<0.000000e+00> : vector<1x32xf32>
    %6 = vector.multi_reduction <add>, %5, %cst [2] : vector<1x32x256xf32> to vector<1x32xf32>
    %7 = arith.addf %3, %6 : vector<1x32xf32>
    %cst_7 = arith.constant dense<0xFF800000> : vector<1x32xf32>
    %8 = vector.multi_reduction <maximumf>, %5, %cst_7 [2] : vector<1x32x256xf32> to vector<1x32xf32>
    %9 = arith.maximumf %4, %8 : vector<1x32xf32>
    %c0_8 = arith.constant 0 : index
    %c0_9 = arith.constant 0 : index
    %10 = vector.load %arg6[%c0_8, %c0_9] : memref<1x32xf32, #tpu.memory_space<vmem>>, vector<1x32xf32>
    tpu.vector_store %arg6[%c0_8, %c0_9], %7 {strides = array<i32>} : memref<1x32xf32, #tpu.memory_space<vmem>>, vector<1x32xf32>,
    %c0_10 = arith.constant 0 : index
    %c0_11 = arith.constant 0 : index
    %11 = vector.load %arg7[%c0_10, %c0_11] : memref<1x32xf32, #tpu.memory_space<vmem>>, vector<1x32xf32>
    tpu.vector_store %arg7[%c0_10, %c0_11], %9 {strides = array<i32>} : memref<1x32xf32, #tpu.memory_space<vmem>>, vector<1x32xf32>,
    %c0_i32_12 = arith.constant 0 : i32
    %12 = arith.cmpi eq, %arg1, %c0_i32_12 : i32
    %13 = arith.extui %12 : i1 to i32
    %c0_i32_13 = arith.constant 0 : i32
    %14 = arith.cmpi ne, %13, %c0_i32_13 : i32
    scf.if %14 {
      %c0_14 = arith.constant 0 : index
      %c0_15 = arith.constant 0 : index
      %15 = vector.load %arg6[%c0_14, %c0_15] : memref<1x32xf32, #tpu.memory_space<vmem>>, vector<1x32xf32>
      %cst_16 = arith.constant 3.906250e-03 : f32
      %16 = vector.broadcast %cst_16 : f32 to vector<1x32xf32>
      %17 = arith.mulf %15, %16 : vector<1x32xf32>
      %c0_17 = arith.constant 0 : index
      %c0_18 = arith.constant 0 : index
      %18 = vector.load %arg7[%c0_17, %c0_18] : memref<1x32xf32, #tpu.memory_space<vmem>>, vector<1x32xf32>
      %c0_19 = arith.constant 0 : index
      %c0_20 = arith.constant 0 : index
      %19 = vector.load %arg3[%c0_19, %c0_20] : memref<32x2xf32, #tpu.memory_space<vmem>>, vector<32x2xf32>
      %cst_21 = arith.constant dense<0.000000e+00> : vector<1x2xf32>
      %20 = tpu.matmul %17, %19, %cst_21 {dimension_numbers = #tpu.dot_dimension_numbers<[1], [0], [0], [1], [0, 0, 1, 1], [], []>} : vector<1x32xf32>, vector<32x2xf32>, vector<1x2xf32> -> vector<1x2xf32>
      %cst_22 = arith.constant 0.000000e+00 : f32
      %21 = vector.broadcast %cst_22 : f32 to vector<1x2xf32>
      %22 = arith.maximumf %20, %21 : vector<1x2xf32>
      %c0_23 = arith.constant 0 : index
      %c0_24 = arith.constant 0 : index
      %23 = vector.load %arg4[%c0_23, %c0_24] : memref<2x32xf32, #tpu.memory_space<vmem>>, vector<2x32xf32>
      %cst_25 = arith.constant dense<0.000000e+00> : vector<1x32xf32>
      %24 = tpu.matmul %22, %23, %cst_25 {dimension_numbers = #tpu.dot_dimension_numbers<[1], [0], [0], [1], [0, 0, 1, 1], [], []>} : vector<1x2xf32>, vector<2x32xf32>, vector<1x32xf32> -> vector<1x32xf32>
      %c0_26 = arith.constant 0 : index
      %c0_27 = arith.constant 0 : index
      %25 = vector.load %arg3[%c0_26, %c0_27] : memref<32x2xf32, #tpu.memory_space<vmem>>, vector<32x2xf32>
      %cst_28 = arith.constant dense<0.000000e+00> : vector<1x2xf32>
      %26 = tpu.matmul %18, %25, %cst_28 {dimension_numbers = #tpu.dot_dimension_numbers<[1], [0], [0], [1], [0, 0, 1, 1], [], []>} : vector<1x32xf32>, vector<32x2xf32>, vector<1x2xf32> -> vector<1x2xf32>
      %cst_29 = arith.constant 0.000000e+00 : f32
      %27 = vector.broadcast %cst_29 : f32 to vector<1x2xf32>
      %28 = arith.maximumf %26, %27 : vector<1x2xf32>
      %c0_30 = arith.constant 0 : index
      %c0_31 = arith.constant 0 : index
      %29 = vector.load %arg4[%c0_30, %c0_31] : memref<2x32xf32, #tpu.memory_space<vmem>>, vector<2x32xf32>
      %cst_32 = arith.constant dense<0.000000e+00> : vector<1x32xf32>
      %30 = tpu.matmul %28, %29, %cst_32 {dimension_numbers = #tpu.dot_dimension_numbers<[1], [0], [0], [1], [0, 0, 1, 1], [], []>} : vector<1x2xf32>, vector<2x32xf32>, vector<1x32xf32> -> vector<1x32xf32>
      %31 = arith.addf %24, %30 : vector<1x32xf32>
      %32 = arith.negf %31 : vector<1x32xf32>
      %33 = math.exp %32 : vector<1x32xf32>
      %cst_33 = arith.constant 1.000000e+00 : f32
      %34 = vector.broadcast %cst_33 : f32 to vector<1x32xf32>
      %35 = arith.addf %34, %33 : vector<1x32xf32>
      %36 = arith.divf %34, %35 : vector<1x32xf32>
      %37 = vector.shape_cast %36 : vector<1x32xf32> to vector<1x1x32xf32>
      %c0_34 = arith.constant 0 : index
      %c0_35 = arith.constant 0 : index
      %c0_36 = arith.constant 0 : index
      %38 = vector.load %arg5[%c0_34, %c0_35, %c0_36] : memref<1x1x32xf32, #tpu.memory_space<vmem>>, vector<1x1x32xf32>
      tpu.vector_store %arg5[%c0_34, %c0_35, %c0_36], %37 {strides = array<i32>} : memref<1x1x32xf32, #tpu.memory_space<vmem>>, vector<1x1x32xf32>,
    } else {
    }
    return
  }
  func.func @transform_0(%arg0: i32, %arg1: i32) -> (i32, i32, i32) {
    %c0_i32 = arith.constant 0 : i32
    %c0_i32_0 = arith.constant 0 : i32
    return %arg0, %c0_i32, %arg1 : i32, i32, i32
  }
  func.func @transform_1(%arg0: i32, %arg1: i32) -> (i32, i32) {
    %c0_i32 = arith.constant 0 : i32
    %c0_i32_0 = arith.constant 0 : i32
    %c0_i32_1 = arith.constant 0 : i32
    return %c0_i32, %c0_i32_0 : i32, i32
  }
  func.func @transform_2(%arg0: i32, %arg1: i32) -> (i32, i32) {
    %c0_i32 = arith.constant 0 : i32
    %c0_i32_0 = arith.constant 0 : i32
    %c0_i32_1 = arith.constant 0 : i32
    return %c0_i32, %c0_i32_0 : i32, i32
  }
  func.func @transform_3(%arg0: i32, %arg1: i32) -> (i32, i32, i32) {
    %c0_i32 = arith.constant 0 : i32
    %c0_i32_0 = arith.constant 0 : i32
    %c0_i32_1 = arith.constant 0 : i32
    return %arg0, %c0_i32, %c0_i32_0 : i32, i32, i32
  }
}

</mosaic_0001>

<bundles_post_ra>
// kernel: tpu_custom_call.1
= control target key start
LH: loop header
LB: loop body
LE: loop exit
PB: predicated region body
PF: predicated region fallthrough
CT: control target
= control target key end

     0   :  { %8 = vsyncpa [#allocation5], 0  ;;  %s2078_s0 = inlined_call_operand.hbm [shape: f32[2,32,256], index: 0, kind: input, shape index: {}]   ;;  %s2079_s1 = inlined_call_operand.vmem [shape: f32[32,2], index: 1, kind: input, shape index: {}]   ;;  %s2080_s2 = inlined_call_operand.vmem [shape: f32[2,32], index: 2, kind: input, shape index: {}]   ;;  %s2081_s3 = inlined_call_operand.hbm [shape: f32[2,1,32], index: 3, kind: output, shape index: {}]  }
   0x1   :  { %10 = vsyncpa [#allocation5 + $0x1], 0 }
   0x2   :  { %11 = vsyncpa [#allocation6], 0 }
   0x3   :  { %13 = vsyncpa [#allocation6 + $0x1], 0  ;;  %s1714_s12 = smov 0   ;;  %s1716_s13 = smov 0  }
   0x4   :  { %s1718_s14 = smov 0   ;;  %s1720_s15 = smov 0  }
   0x5   :  { %s1722_s16 = smov 0   ;;  %s1724_s17 = smov 0  }
   0x6 LB: > { %s1415_s18 = sadd.s32 4294967295, %s1682_s17   ;;  %s1416_s19 = sadd.s32 4294967294, %s1682_s17   ;;  %s1682_s17 = sphi %s1724_s17, %s19_s17   ;;  %s1678_s16 = sphi %s1722_s16, %s2096_s16   ;;  %s1674_s15 = sphi %s1720_s15, %s2095_s15   ;;  %s1670_s14 = sphi %s1718_s14, %s2094_s14   ;;  %s1666_s13 = sphi %s1716_s13, %s2093_s13   ;;  %s1662_s12 = sphi %s1714_s12, %s2092_s12  }
   0x7   : > { %s31_s20 = sadd.s32 1, %s1678_s16  ;;  %s40_s21 = sadd.s32 1, %s1670_s14 }
   0x8   : > { %p33_p0 = scmp.ge.s32.totalorder %s31_s20, 2  ;;  %p47_p1 = scmp.ne.s32.totalorder %s1670_s14, %s1666_s13 }
   0x9   : > { %p48_p2 = scmp.eq.s32.totalorder %s1682_s17, 0  ;;  %p53_p3 = scmp.ne.s32.totalorder %s1666_s13, %s1662_s12 }
   0xa   : > { %s2098_s20 = smov (%p33_p0, %s31_s20), 0  ;;  %p54_p5 = scmp.eq.s32.totalorder %s1415_s18, 0 }
   0xb   : > { %p1755_p4 = por %p48_p2, %p47_p1  ;;  %s35_s23 = ssub.s32 %s1678_s16, %s2098_s20 }
   0xc   : > { %p119_p6 = scmp.eq.s32.totalorder %s1415_s18, 1  ;;  %p38_p7 = scmp.eq.s32.totalorder %s35_s23, 0 }
   0xd   : > { %p1761_p8 = por %p54_p5, %p53_p3  ;;  %p125_p10 = scmp.eq.s32.totalorder %s1416_s19, 1 }
   0xe   : > { %p1765_p9 = por %p119_p6, %p47_p1  ;;  %p1506_p13 = scmp.lt.s32.totalorder %s1682_s17, 2 }
   0xf   : > { %s1770_s26 = scalar_select %p38_p7, %s1670_s14, %s40_s21  }
  0x10   : > { %s2085_s25 = scalar_select %p1765_p9, 1, 0 }
  0x11   : > { %p1772_p11 = por %p125_p10, %p53_p3  ;;  %s151_s28 = sand.u32 1, %s1670_s14  }
  0x12   : > { %s1419_s29 = sshll.u32 %s151_s28, 6  ;;  %s1434_s30 = sshll.u32 %s1678_s16, 10 }
  0x13   : > { %s2086_s27 = scalar_select %p1772_p11, 1, 0 }
  0x14   : > { %s1783_s6 = scalar_lea.hbm %s2078_s0, %s1434_s30  ;;  %s155_s7 = scalar_lea.vmem [#allocation4], %s1419_s29 }
  0x15   : > { %s164_s8 = sshll.u32 %s155_s7, 4  ;;  %p1789_p0 = pnand %p1506_p13, %p1755_p4  ;;  %s1785_s8 = int_to_ptr.vmem [resolvable:$true] %s164_s8 }
  0x16   : > { %s1794_s10 = scalar_lea.sflag [#allocation5], %s151_s28  ;;  %s1570_s11 = scalar_lea.hbm %s1783_s6, 1024 }
  0x17   : > { %p1571_p2 = scmp.ne.s32.totalorder %s1783_s6, %s1570_s11  ;;  %p1572_p3 = pneg %p1789_p0 }
  0x18   : > { %s1575_s21 = scalar_lea.hbm %s2078_s0, 2048  ;;  %p1576_p4 = scmp.lt.u32.totalorder %s1783_s6, %s2078_s0 }
  0x19   : > { %p1573_p5 = pnand %p1572_p3, %p1571_p2  ;;  %p1577_p7 = scmp.lt.u32.totalorder %s1575_s21, %s1570_s11 }
  0x1a   : > { %p1579_p13 = scmp.lt.u32.totalorder %s1570_s11, %s1783_s6 }
  0x1b   : > { %p1574_p6 = pneg %p1573_p5  ;;  %p1578_p10 = por %p1577_p7, %p1576_p4 }
  0x1d   : > { %p1580_p12 = por %p1579_p13, %p1578_p10 }
  0x1f   : > { %p1581_p1 = pnand %p1580_p12, %p1574_p6 }
  0x21   : > { %1584 = shalt.err (!%p1581_p1)
}
  0x22   : > { %s1585_s28 = scalar_lea.vmem %s1785_s8, 1024  ;;  %s1684_s29 = smov [#allocation4]  }
  0x23   : > { %p1586_p2 = scmp.ne.s32.totalorder %s1785_s8, %s1585_s28  ;;  %s1590_s30 = sshll.u32 %s1684_s29, 4  ;;  %s1591_s30 = int_to_ptr.vmem [resolvable:$false] %s1590_s30 }
  0x24   : > { %s1592_s4 = scalar_lea.vmem %s1591_s30, 2048  ;;  %p1593_p9 = scmp.lt.s32.totalorder %s1785_s8, %s1591_s30 }
  0x25   : > { %p1588_p5 = pnand %p1586_p2, %p1572_p3  ;;  %p1594_p4 = scmp.lt.s32.totalorder %s1592_s4, %s1585_s28 }
  0x27   : > { %p1589_p11 = pneg %p1588_p5  ;;  %p1595_p7 = por %p1594_p4, %p1593_p9 }
  0x29   : > { %p1596_p10 = pnand %p1595_p7, %p1589_p11 }
  0x2b   : > { %1599 = shalt.err (!%p1596_p10)
}
  0x2c   : > { %s1685_s5 = smov 256   ;;  %s1686_s7 = smov 16  }
  0x2d   : > { %1501 = dma.hbm_to_vmem [thread:$0]  (!%p1789_p0), %s1783_s6, 1024, %s1785_s8, %s1794_s10, %s1685_s5, %s1685_s5, %s1686_s7  }
  0x2e   : > { %p172_p12 = scmp.lt.s32.totalorder %s1682_s17, 3  ;;  %p2088_p1 = scmp.ge.s32.totalorder %s1682_s17, 1 }
  0x30   : > { %p173_p3 = pnand %p2088_p1, %p172_p12 }
  0x31   : > { %s1826_s11 = sand.u32 (!%p173_p3), 1, %s1666_s13  }
  0x32   : > { %176 = sbr.rel (%p173_p3) target bundleno = 865 (0x361), region = 32  ;;  %s1423_s18 = sshll.u32 (!%p173_p3), %s1826_s11, 6 }
  0x33   : > { %s179_s19 = scalar_lea.sflag (!%p173_p3), [#allocation5], %s1826_s11  ;;  %s182_s21 = scalar_lea.vmem (!%p173_p3), [#allocation4], %s1423_s18 }
  0x39   : > { %1653 = dma.done.wait (%p1761_p8), %s179_s19, 1024  }
  0x3a   : > { %1655 = vsyncadd (%p1761_p8), %s179_s19, 4294966272  ;;  %v214_v0 = vld [vmem:[%s182_s21] sm:$0xff]  ;;  %v215_v1 = vld [vmem:[%s182_s21 + $0x8] sm:$0xff]  ;;  %v1687_v16 = vmov 0   ;;  %v238_v17 = vlaneseq  ;;  %v1688_v18 = vmov 1966171168  }
  0x3b   : > { %v216_v2 = vld [vmem:[%s182_s21 + $0x10] sm:$0xff]  ;;  %v222_v3 = vadd.f32 %v215_v1, %v214_v0  ;;  %v217_v4 = vld [vmem:[%s182_s21 + $0x18] sm:$0xff]  ;;  %v218_v5 = vld [vmem:[%s182_s21 + $0x20] sm:$0xff]  ;;  %v617_v12 = vmax.f32 %v214_v0, %v215_v1  ;;  %1564 = vset.pattern.permute.xlu0 %v1687_v16  ;;  %1565 = vset.pattern.permute.xlu1 %v1687_v16  ;;  %v371_v19 = vunpack.c.l.s4 %v1688_v18  ;;  %vm209_vm0 = vcmask 253952   ;;  %s1431_s4 = sshll.u32 %s1674_s15, 4  ;;  %s203_s5 = scalar_lea.vmem [#allocation7], %s1826_s11 }
  0x3c   : > { %v219_v6 = vld [vmem:[%s182_s21 + $0x28] sm:$0xff]  ;;  %v220_v8 = vld [vmem:[%s182_s21 + $0x30] sm:$0xff]  ;;  %v221_v9 = vld [vmem:[%s182_s21 + $0x38] sm:$0xff]  ;;  %v225_v10 = vadd.f32 %v217_v4, %v216_v2  ;;  %v620_v13 = vmax.f32 %v216_v2, %v217_v4  ;;  %v1835_v20 = vshrl.u32 %v238_v17, 7  ;;  %vm1692_vm1 = vmmov 0   ;;  %s1338_s7 = sshll.u32 %s203_s5, 4  ;;  %s2028_s21 = scalar_lea.hbm %s2081_s3, %s1431_s4  ;;  %s2030_s7 = int_to_ptr.vmem [resolvable:$true] %s1338_s7 }
  0x3d   : > { %v228_v7 = vadd.f32 %v219_v6, %v218_v5  ;;  %223 = vadd.xlane.f32.xlu0 %v222_v3  ;;  %v231_v11 = vadd.f32 %v221_v9, %v220_v8  ;;  %v623_v14 = vmax.f32 %v218_v5, %v219_v6  ;;  %v626_v15 = vmax.f32 %v220_v8, %v221_v9  ;;  %s1326_s24 = scalar_lea.sflag [#allocation6], %s1826_s11  ;;  %s1600_s6 = scalar_lea.vmem %s2030_s7, 16 }
  0x3e   : > { %v372_v21 = vunpack.c.0.s8 %v371_v19  ;;  %v1838_v22 = vsub.s32 0, %v1835_v20  ;;  %v1841_v23 = vsub.s32 1, %v1835_v20  ;;  %v1844_v24 = vsub.s32 2, %v1835_v20  ;;  %p1601_p8 = scmp.ne.s32.totalorder %s2030_s7, %s1600_s6  ;;  %p2089_p9 = scmp.ne.s32.totalorder %s2085_s25, 0 }
  0x3f   : > { %229 = vadd.xlane.f32.xlu1 %v228_v7  ;;  %v1847_v25 = vsub.s32 3, %v1835_v20  ;;  %v1850_v26 = vsub.s32 4, %v1835_v20  ;;  %v1853_v27 = vsub.s32 5, %v1835_v20  ;;  %v1856_v28 = vsub.s32 6, %v1835_v20  ;;  %s1693_s15 = smov [#allocation7]  }
  0x40   : > { %v1859_v29 = vsub.s32 7, %v1835_v20  ;;  %v1862_v31 = vsub.s32 %v372_v21, %v1835_v20  ;;  %vm585_vm2 = vcmask 130112   ;;  %vm592_vm3 = vcmask 195712   ;;  %p1602_p11 = pnand %p1601_p8, %p2089_p9  ;;  %s1604_s8 = sshll.u32 %s1693_s15, 4  ;;  %s1605_s8 = int_to_ptr.vmem [resolvable:$false] %s1604_s8 }
  0x41   : > { %226 = vadd.xlane.f32.xlu0 %v225_v10  ;;  %vm599_vm4 = vcmask 261312   ;;  %vm1017_vm5 = vcmask 261120   ;;  %vm1171_vm6 = vcmask 1041408   ;;  %vm1167_vm7 = vcmask 15360   ;;  %s1606_s9 = scalar_lea.vmem %s1605_s8, 32  ;;  %p1607_p6 = scmp.lt.s32.totalorder %s2030_s7, %s1605_s8 }
  0x42   : > { %p1603_p0 = pneg %p1602_p11  ;;  %p1608_p13 = scmp.lt.s32.totalorder %s1606_s9, %s1600_s6 }
  0x43   : > { %232 = vadd.xlane.f32.xlu1 %v231_v11 }
  0x44   : > { %p1609_p2 = por %p1608_p13, %p1607_p6 }
  0x45   : > { %618 = vmax.xlane.f32.xlu0 %v617_v12 }
  0x46   : > { %p1610_p5 = pnand %p1609_p2, %p1603_p0 }
  0x47   : > { %621 = vmax.xlane.f32.xlu1 %v620_v13 }
  0x49   : > { %624 = vmax.xlane.f32.xlu0 %v623_v14 }
  0x4b   : > { %627 = vmax.xlane.f32.xlu1 %v626_v15 }
  0xca   : > { %v224_v30 = vpop.xlane.xlu0 %223 }
  0xcb   : > { %v241_v33 = vrot.slane %v224_v30, %v1838_v22  ;;  %v245_v34 = vrot.slane %v224_v30, %v1841_v23  ;;  %v249_v35 = vrot.slane %v224_v30, %v1844_v24  ;;  %v253_v36 = vrot.slane %v224_v30, %v1847_v25 }
  0xcc   : > { %v230_v32 = vpop.xlane.xlu1 %229  ;;  %v257_v37 = vrot.slane %v224_v30, %v1850_v26  ;;  %v261_v38 = vrot.slane %v224_v30, %v1853_v27  ;;  %v265_v39 = vrot.slane %v224_v30, %v1856_v28  ;;  %v269_v40 = vrot.slane %v224_v30, %v1859_v29 }
  0xcd   : > { %v366_v41 = vcombine.low %v241_v33, %v245_v34  ;;  %v367_v42 = vcombine.low %v249_v35, %v253_v36  ;;  %v305_v43 = vrot.slane %v230_v32, %v1838_v22  ;;  %v309_v44 = vrot.slane %v230_v32, %v1841_v23 }
  0xce   : > { %v227_v45 = vpop.xlane.xlu0 %226  ;;  %v368_v46 = vcombine.low %v257_v37, %v261_v38  ;;  %v369_v47 = vcombine.low %v265_v39, %v269_v40  ;;  %v313_v48 = vrot.slane %v230_v32, %v1844_v24  ;;  %v317_v49 = vrot.slane %v230_v32, %v1847_v25 }
  0xcf   : > { %v376_v50 = vrot.slane %v366_v41, %v1862_v31  ;;  %v383_v51 = vrot.slane %v367_v42, %v1862_v31  ;;  %v273_v52 = vrot.slane %v227_v45, %v1838_v22  ;;  %v277_v53 = vrot.slane %v227_v45, %v1841_v23 }
  0xd0   : > { %v390_v54 = vrot.slane %v368_v46, %v1862_v31  ;;  %v397_v55 = vrot.slane %v369_v47, %v1862_v31  ;;  %v281_v56 = vrot.slane %v227_v45, %v1844_v24  ;;  %v285_v57 = vrot.slane %v227_v45, %v1847_v25  ;;  %v233_v6 = vpop.xlane.xlu1 %232 }
  0xd1   : > { %v398_v58 = vcombine.low %v376_v50, %v383_v51  ;;  %v289_v59 = vrot.slane %v227_v45, %v1850_v26  ;;  %v293_v60 = vrot.slane %v227_v45, %v1853_v27  ;;  %v297_v61 = vrot.slane %v227_v45, %v1856_v28 }
  0xd2   : > { %v399_v62 = vcombine.low %v390_v54, %v397_v55  ;;  %v301_v63 = vrot.slane %v227_v45, %v1859_v29  ;;  %v415_v0 = vcombine.low %v273_v52, %v277_v53  ;;  %v416_v1 = vcombine.low %v281_v56, %v285_v57  ;;  %v619_v42 = vpop.xlane.xlu0 %618 }
  0xd3   : > { %v406_v2 = vrot.slane %v398_v58, %v1862_v31  ;;  %v417_v3 = vcombine.low %v289_v59, %v293_v60  ;;  %v321_v4 = vrot.slane %v230_v32, %v1850_v26  ;;  %v325_v5 = vrot.slane %v230_v32, %v1853_v27 }
  0xd4   : > { %v413_v7 = vrot.slane %v399_v62, %v1862_v31  ;;  %v418_v8 = vcombine.low %v297_v61, %v301_v63  ;;  %v425_v9 = vrot.slane %v415_v0, %v1862_v31  ;;  %v432_v10 = vrot.slane %v416_v1, %v1862_v31  ;;  %v622_v59 = vpop.xlane.xlu1 %621 }
  0xd5   : > { %v439_v11 = vrot.slane %v417_v3, %v1862_v31  ;;  %v329_v12 = vrot.slane %v230_v32, %v1856_v28  ;;  %v333_v13 = vrot.slane %v230_v32, %v1859_v29  ;;  %v464_v14 = vcombine.low %v305_v43, %v309_v44 }
  0xd6   : > { %v414_v15 = vcombine.low %v406_v2, %v413_v7  ;;  %v446_v16 = vrot.slane %v418_v8, %v1862_v31  ;;  %v447_v18 = vcombine.low %v425_v9, %v432_v10  ;;  %v465_v19 = vcombine.low %v313_v48, %v317_v49 }
  0xd7   : > { %v466_v21 = vcombine.low %v321_v4, %v325_v5  ;;  %v467_v30 = vcombine.low %v329_v12, %v333_v13  ;;  %v474_v33 = vrot.slane %v464_v14, %v1862_v31  ;;  %v337_v34 = vrot.slane %v233_v6, %v1838_v22 }
  0xd8   : > { %563 = vperm.xlu0 %1564, %v414_v15   ;;  %v448_v35 = vcombine.low %v439_v11, %v446_v16  ;;  %v455_v36 = vrot.slane %v447_v18, %v1862_v31  ;;  %v481_v37 = vrot.slane %v465_v19, %v1862_v31  ;;  %v341_v32 = vrot.slane %v233_v6, %v1841_v23 }
  0xd9   : > { %v488_v38 = vrot.slane %v466_v21, %v1862_v31  ;;  %v495_v39 = vrot.slane %v467_v30, %v1862_v31  ;;  %v345_v40 = vrot.slane %v233_v6, %v1844_v24  ;;  %v349_v41 = vrot.slane %v233_v6, %v1847_v25  ;;  %v625_v30 = vpop.xlane.xlu0 %624 }
  0xda   : > { %v462_v43 = vrot.slane %v448_v35, %v1862_v31  ;;  %v496_v44 = vcombine.low %v474_v33, %v481_v37  ;;  %v353_v45 = vrot.slane %v233_v6, %v1850_v26  ;;  %v357_v46 = vrot.slane %v233_v6, %v1853_v27 }
  0xdb   : > { %v497_v47 = vcombine.low %v488_v38, %v495_v39  ;;  %v361_v48 = vrot.slane %v233_v6, %v1856_v28  ;;  %v365_v49 = vrot.slane %v233_v6, %v1859_v29  ;;  %v513_v50 = vcombine.low %v337_v34, %v341_v32 }
  0xdc   : > { %v463_v51 = vcombine.low %v455_v36, %v462_v43  ;;  %v504_v52 = vrot.slane %v496_v44, %v1862_v31  ;;  %v514_v53 = vcombine.low %v345_v40, %v349_v41  ;;  %v515_v54 = vcombine.low %v353_v45, %v357_v46 }
  0xdd   : > { %v511_v55 = vrot.slane %v497_v47, %v1862_v31  ;;  %v516_v56 = vcombine.low %v361_v48, %v365_v49  ;;  %v523_v57 = vrot.slane %v513_v50, %v1862_v31  ;;  %v636_v58 = vrot.slane %v619_v42, %v1838_v22 }
  0xde   : > { %566 = vperm.xlu1 %1565, %v463_v51   ;;  %v530_v60 = vrot.slane %v514_v53, %v1862_v31  ;;  %v537_v61 = vrot.slane %v515_v54, %v1862_v31  ;;  %v640_v62 = vrot.slane %v619_v42, %v1841_v23  ;;  %v644_v63 = vrot.slane %v619_v42, %v1844_v24 }
  0xdf   : > { %v512_v0 = vcombine.low %v504_v52, %v511_v55  ;;  %v544_v1 = vrot.slane %v516_v56, %v1862_v31  ;;  %v648_v2 = vrot.slane %v619_v42, %v1847_v25  ;;  %v652_v3 = vrot.slane %v619_v42, %v1850_v26  ;;  %v628_v52 = vpop.xlane.xlu1 %627 }
  0xe0   : > { %v545_v4 = vcombine.low %v523_v57, %v530_v60  ;;  %v656_v5 = vrot.slane %v619_v42, %v1853_v27  ;;  %v660_v6 = vrot.slane %v619_v42, %v1856_v28  ;;  %v664_v7 = vrot.slane %v619_v42, %v1859_v29 }
  0xe1   : > { %v546_v8 = vcombine.low %v537_v61, %v544_v1  ;;  %v761_v9 = vcombine.low %v636_v58, %v640_v62  ;;  %v762_v10 = vcombine.low %v644_v63, %v648_v2  ;;  %v668_v11 = vrot.slane %v622_v59, %v1838_v22 }
  0xe2   : > { %569 = vperm.xlu1 %1565, %v512_v0   ;;  %v553_v12 = vrot.slane %v545_v4, %v1862_v31  ;;  %v763_v13 = vcombine.low %v652_v3, %v656_v5  ;;  %v764_v14 = vcombine.low %v660_v6, %v664_v7  ;;  %v672_v15 = vrot.slane %v622_v59, %v1841_v23 }
  0xe3   : > { %v560_v16 = vrot.slane %v546_v8, %v1862_v31  ;;  %v771_v18 = vrot.slane %v761_v9, %v1862_v31  ;;  %v778_v19 = vrot.slane %v762_v10, %v1862_v31  ;;  %v676_v21 = vrot.slane %v622_v59, %v1844_v24 }
  0xe4   : > { %v785_v33 = vrot.slane %v763_v13, %v1862_v31  ;;  %v792_v34 = vrot.slane %v764_v14, %v1862_v31  ;;  %v680_v35 = vrot.slane %v622_v59, %v1847_v25  ;;  %v684_v36 = vrot.slane %v622_v59, %v1850_v26 }
  0xe5   : > { %v561_v37 = vcombine.low %v553_v12, %v560_v16  ;;  %v793_v32 = vcombine.low %v771_v18, %v778_v19  ;;  %v688_v38 = vrot.slane %v622_v59, %v1853_v27  ;;  %v692_v39 = vrot.slane %v622_v59, %v1856_v28 }
  0xe6   : > { %v794_v40 = vcombine.low %v785_v33, %v792_v34  ;;  %v696_v41 = vrot.slane %v622_v59, %v1859_v29  ;;  %v810_v42 = vcombine.low %v668_v11, %v672_v15  ;;  %v811_v43 = vcombine.low %v676_v21, %v680_v35 }
  0xe7   : > { %572 = vperm.xlu1 %1565, %v561_v37   ;;  %v801_v44 = vrot.slane %v793_v32, %v1862_v31  ;;  %v812_v45 = vcombine.low %v684_v36, %v688_v38  ;;  %v700_v46 = vrot.slane %v625_v30, %v1838_v22  ;;  %v704_v47 = vrot.slane %v625_v30, %v1841_v23  ;;  %v1013_v37 = vld [vmem:[%s2079_s1] sm:$0xff]  ;;  %v1014_v32 = vld [vmem:[%s2079_s1 + $0x8] sm:$0xff] }
  0xe8   : > { %v808_v48 = vrot.slane %v794_v40, %v1862_v31  ;;  %v813_v49 = vcombine.low %v692_v39, %v696_v41  ;;  %v820_v50 = vrot.slane %v810_v42, %v1862_v31  ;;  %v827_v51 = vrot.slane %v811_v43, %v1862_v31 }
  0xe9   : > { %v834_v53 = vrot.slane %v812_v45, %v1862_v31  ;;  %v708_v54 = vrot.slane %v625_v30, %v1844_v24  ;;  %v712_v55 = vrot.slane %v625_v30, %v1847_v25  ;;  %v716_v56 = vrot.slane %v625_v30, %v1850_v26  ;;  %v1016_v45 = vld [vmem:[%s2079_s1 + $0x18] sm:$0xff] }
  0xea   : > { %v809_v57 = vcombine.low %v801_v44, %v808_v48  ;;  %v841_v58 = vrot.slane %v813_v49, %v1862_v31  ;;  %v842_v59 = vcombine.low %v820_v50, %v827_v51  ;;  %v720_v60 = vrot.slane %v625_v30, %v1853_v27  ;;  %v1015_v44 = vld [vmem:[%s2079_s1 + $0x10] sm:$0xff] }
  0xeb   : > { %v724_v61 = vrot.slane %v625_v30, %v1856_v28  ;;  %v728_v62 = vrot.slane %v625_v30, %v1859_v29  ;;  %v859_v63 = vcombine.low %v700_v46, %v704_v47  ;;  %v860_v0 = vcombine.low %v708_v54, %v712_v55 }
  0xec   : > { %958 = vperm.xlu1 %1565, %v809_v57   ;;  %v843_v1 = vcombine.low %v834_v53, %v841_v58  ;;  %v850_v2 = vrot.slane %v842_v59, %v1862_v31  ;;  %v861_v3 = vcombine.low %v716_v56, %v720_v60  ;;  %v732_v4 = vrot.slane %v628_v52, %v1838_v22 }
  0xed   : > { %v862_v5 = vcombine.low %v724_v61, %v728_v62  ;;  %v869_v6 = vrot.slane %v859_v63, %v1862_v31  ;;  %v876_v7 = vrot.slane %v860_v0, %v1862_v31  ;;  %v736_v8 = vrot.slane %v628_v52, %v1841_v23 }
  0xee   : > { %v857_v9 = vrot.slane %v843_v1, %v1862_v31  ;;  %v883_v10 = vrot.slane %v861_v3, %v1862_v31  ;;  %v740_v11 = vrot.slane %v628_v52, %v1844_v24  ;;  %v744_v12 = vrot.slane %v628_v52, %v1847_v25 }
  0xef   : > { %v890_v13 = vrot.slane %v862_v5, %v1862_v31  ;;  %v891_v14 = vcombine.low %v869_v6, %v876_v7  ;;  %v748_v22 = vrot.slane %v628_v52, %v1850_v26  ;;  %v752_v15 = vrot.slane %v628_v52, %v1853_v27 }
  0xf0   : > { %v858_v16 = vcombine.low %v850_v2, %v857_v9  ;;  %v756_v18 = vrot.slane %v628_v52, %v1856_v28  ;;  %v760_v23 = vrot.slane %v628_v52, %v1859_v29  ;;  %v908_v19 = vcombine.low %v732_v4, %v736_v8 }
  0xf1   : > { %v892_v21 = vcombine.low %v883_v10, %v890_v13  ;;  %v899_v30 = vrot.slane %v891_v14, %v1862_v31  ;;  %v909_v33 = vcombine.low %v740_v11, %v744_v12  ;;  %v910_v24 = vcombine.low %v748_v22, %v752_v15 }
  0xf2   : > { %961 = vperm.xlu1 %1565, %v858_v16   ;;  %v911_v25 = vcombine.low %v756_v18, %v760_v23  ;;  %v918_v34 = vrot.slane %v908_v19, %v1862_v31  ;;  %v1689_v39 = vmov 0.0   ;;  %v1690_v41 = vmov 0.0|0.0  }
  0xf3   : > { %v906_v35 = vrot.slane %v892_v21, %v1862_v31  ;;  %v925_v26 = vrot.slane %v909_v33, %v1862_v31  ;;  %v932_v27 = vrot.slane %v910_v24, %v1862_v31  ;;  %210 = vst.msk [vmem:[#allocation2] sm:$0x1] %vm209_vm0, %v1689_v39  ;;  %1481 = vmatprep.subr.bf16.mxu0 %v1690_v41  ;;  %v1691_v47 = vmov -inf   ;;  %v1092_v24 = vld [vmem:[%s2080_s2] sm:$0x3] }
  0xf4   : > { %v939_v28 = vrot.slane %v911_v25, %v1862_v31  ;;  %v1482_v42 = vpack.c.bf16 %v1014_v32, %v1013_v37  ;;  %1487 = vmatprep.subr.bf16.mxu1 %v1690_v41  ;;  %211 = vst.msk [vmem:[#allocation3] sm:$0x1] %vm209_vm0, %v1691_v47  ;;  %v1485_v48 = vpack.c.bf16 %v1016_v45, %v1015_v44  ;;  %v575_v49 = vand.u32 127, %v238_v17 }
  0xf5   : > { %v907_v29 = vcombine.low %v899_v30, %v906_v35  ;;  %v940_v36 = vcombine.low %v918_v34, %v925_v26  ;;  %1457 = vmatprep.mubr.msk.f32.mxu0 %vm1692_vm1, %v1689_v39  ;;  %1468 = vmatprep.mubr.msk.f32.mxu1 %vm1692_vm1, %v1689_v39 }
  0xf6   : > { %v941_v38 = vcombine.low %v932_v27, %v939_v28  ;;  %1483 = vmatpush3.bf16.msra.mxu0 %v1482_v42  ;;  %1489 = vmatpush3.bf16.msra.mxu1 %v1482_v42  ;;  %v580_v50 = vadd.s32 4294967288, %v575_v49  ;;  %v587_v51 = vadd.s32 4294967280, %v575_v49  ;;  %v594_v54 = vadd.s32 4294967272, %v575_v49 }
  0xf7   : > { %964 = vperm.xlu1 %1565, %v907_v29   ;;  %v948_v40 = vrot.slane %v940_v36, %v1862_v31  ;;  %1484 = vmatprep.subr.bf16.mxu0 %v1690_v41  ;;  %v578_v56 = vsub.s32 %v575_v49, %v1835_v20 }
  0xf8   : > { %v955_v43 = vrot.slane %v941_v38, %v1862_v31  ;;  %1490 = vmatprep.subr.bf16.mxu1 %v1690_v41  ;;  %v583_v53 = vsub.s32 %v580_v50, %v1835_v20  ;;  %v590_v55 = vsub.s32 %v587_v51, %v1835_v20  ;;  %v597_v60 = vsub.s32 %v594_v54, %v1835_v20 }
  0xfa   : > { %v956_v46 = vcombine.low %v948_v40, %v955_v43  ;;  %1486 = vmatpush3.bf16.msra.mxu0 %v1485_v48  ;;  %1492 = vmatpush3.bf16.msra.mxu1 %v1485_v48  ;;  %v212_v4 = vld [vmem:[#allocation2] sm:$0x1] }
  0xfb   : > { %1476 = vmatprep.subr.mxu0 %v1689_v39  ;;  %1471 = vmatprep.subr.mxu1 %v1689_v39  ;;  %v213_v19 = vld [vmem:[#allocation3] sm:$0x1] }
  0xfc   : > { %967 = vperm.xlu1 %1565, %v956_v46  }
 0x157   : > { %v564_v58 = vpop.permute.xlu0 %563 }
 0x158   : > { %v579_v62 = vrot.slane %v564_v58, %v578_v56 }
 0x15d   : > { %v567_v52 = vpop.permute.xlu1 %566 }
 0x15e   : > { %v584_v59 = vrot.slane %v567_v52, %v583_v53 }
 0x160   : > { %v586_v63 = vsel %vm585_vm2, %v584_v59, %v579_v62 }
 0x161   : > { %v570_v57 = vpop.permute.xlu1 %569 }
 0x162   : > { %v591_v61 = vrot.slane %v570_v57, %v590_v55 }
 0x164   : > { %v593_v1 = vsel %vm592_vm3, %v591_v61, %v586_v63 }
 0x166   : > { %v573_v17 = vpop.permute.xlu1 %572 }
 0x167   : > { %v598_v0 = vrot.slane %v573_v17, %v597_v60 }
 0x169   : > { %v600_v2 = vsel %vm599_vm4, %v598_v0, %v593_v1 }
 0x16a   : > { %v607_v3 = vrot.slane %v600_v2, %v1862_v31 }
 0x16b   : > { %v959_v5 = vpop.permute.xlu1 %958 }
 0x16c   : > { %v614_v6 = vrot.slane %v607_v3, %v1862_v31  ;;  %v972_v13 = vrot.slane %v959_v5, %v578_v56 }
 0x16e   : > { %v616_v20 = vadd.f32 %v614_v6, %v212_v4 }
 0x170   : > { %1005 = vst.msk [vmem:[#allocation2] sm:$0x1] %vm209_vm0, %v616_v20 }
 0x171   : > { %v962_v7 = vpop.permute.xlu1 %961 }
 0x172   : > { %v976_v10 = vrot.slane %v962_v7, %v583_v53 }
 0x174   : > { %v977_v22 = vsel %vm585_vm2, %v976_v10, %v972_v13 }
 0x176   : > { %v965_v8 = vpop.permute.xlu1 %964 }
 0x177   : > { %v1010_v9 = vld [vmem:[#allocation2] sm:$0x1]  ;;  %v981_v12 = vrot.slane %v965_v8, %v590_v55 }
 0x178   : > { %v1011_v11 = vmul.f32 0.00390625, %v1010_v9 }
 0x179   : > { %v982_v16 = vsel %vm592_vm3, %v981_v12, %v977_v22 }
 0x17a   : > { %1458 = vmatmul.mubr.msk.f32.vlgmr.msra.gmra.mrb[0].mxu0 %vm1017_vm5, %v1011_v11 }
 0x17b   : > { %v968_v14 = vpop.permute.xlu1 %967  ;;  %1478 = vmatprep.mubr.msk.f32.mxu0 %vm1692_vm1, %v1689_v39  ;;  %1477 = vmatpush3.msk.msra.mxu0 %vm1171_vm6, %v1092_v24 }
 0x17c   : > { %v986_v15 = vrot.slane %v968_v14, %v597_v60 }
 0x17e   : > { %v987_v18 = vsel %vm599_vm4, %v986_v15, %v982_v16 }
 0x17f   : > { %v994_v23 = vrot.slane %v987_v18, %v1862_v31 }
 0x181   : > { %v1001_v21 = vrot.slane %v994_v23, %v1862_v31 }
 0x183   : > { %v1003_v30 = vmax.f32 %v213_v19, %v1001_v21 }
 0x185   : > { %1006 = vst.msk [vmem:[#allocation3] sm:$0x1] %vm209_vm0, %v1003_v30 }
 0x18c   : > { %v1012_v33 = vld [vmem:[#allocation3] sm:$0x1] }
 0x18d   : > { %1469 = vmatmul.mubr.msk.f32.vlgmr.msra.gmra.mrb[0].mxu1 %vm1017_vm5, %v1012_v33 }
 0x18e   : > { %1473 = vmatprep.mubr.msk.f32.mxu1 %vm1692_vm1, %v1689_v39  ;;  %1472 = vmatpush3.msk.msra.mxu1 %vm1171_vm6, %v1092_v24 }
 0x24d   : > { %v1087_v25 = vpop.f32.mrb[0].mxu0 }
 0x24e   : > { %v1091_v34 = vmax.f32 %v1087_v25, 0.0  ;;  %v1459_v31 = vpop.f32.mrb[1].mxu0 }
 0x250   : > { %1479 = vmatmul.mubr.msk.f32.vlgmr.msra.gmra.mrb[2].mxu0 %vm1167_vm7, %v1091_v34 }
 0x260   : > { %v1162_v35 = vpop.f32.mrb[0].mxu1 }
 0x261   : > { %v1166_v26 = vmax.f32 %v1162_v35, 0.0  ;;  %v1470_v27 = vpop.f32.mrb[1].mxu1 }
 0x263   : > { %1474 = vmatmul.mubr.msk.f32.vlgmr.msra.gmra.mrb[2].mxu1 %vm1167_vm7, %v1166_v26 }
 0x323   : > { %v1314_v28 = vpop.f32.mrb[2].mxu0 }
 0x324   : > { %v1480_v29 = vpop.f32.mrb[3].mxu0 }
 0x336   : > { %v1241_v36 = vpop.f32.mrb[2].mxu1 }
 0x337   : > { %v1315_v37 = vadd.f32 %v1314_v28, %v1241_v36  ;;  %v1475_v32 = vpop.f32.mrb[3].mxu1 }
 0x339   : > { %v1430_v38 = vmul.f32 -1.442695, %v1315_v37 }
 0x33b   : > { %1566 = vpow2.f32 %v1430_v38 }
 0x345   : > { %v1567_v39 = vpop.eup %1566 }
 0x346   : > { %v1321_v40 = vadd.f32 1.0, %v1567_v39 }
 0x348   : > { %1568 = vrcp.f32 %v1321_v40 }
 0x352   : > { %v1569_v41 = vpop.eup %1568 }
 0x353   : > { %1324 = vst.msk [vmem:[%s203_s5] sm:$0x1] %vm209_vm0, %v1569_v41 }
 0x354   : > { %1613 = shalt.err (!%p1610_p5)
}
 0x355   : > { %s1614_s11 = scalar_lea.hbm %s2028_s21, 16  ;;  %s1618_s23 = scalar_lea.hbm %s2081_s3, 32 }
 0x356   : > { %p1615_p4 = scmp.ne.s32.totalorder %s2028_s21, %s1614_s11  ;;  %p1619_p12 = scmp.lt.u32.totalorder %s2028_s21, %s2081_s3 }
 0x357   : > { %p1620_p1 = scmp.lt.u32.totalorder %s1618_s23, %s1614_s11  ;;  %p1622_p8 = scmp.lt.u32.totalorder %s1614_s11, %s2028_s21 }
 0x358   : > { %p1616_p7 = pnand %p1615_p4, %p2089_p9 }
 0x359   : > { %p1621_p3 = por %p1620_p1, %p1619_p12 }
 0x35a   : > { %p1617_p10 = pneg %p1616_p7 }
 0x35b   : > { %p1623_p11 = por %p1622_p8, %p1621_p3 }
 0x35d   : > { %p1624_p0 = pnand %p1623_p11, %p1617_p10 }
 0x35f   : > { %1627 = shalt.err (!%p1624_p0)
}
 0x360   : > { %1496 = dma.vmem_to_hbm [thread:$0]  (%p2089_p9), %s2030_s7, 16, %s2028_s21, %s1326_s24  }
 0x361 PF: > { %s1350_s30 = sand.u32 1, %s1662_s12   ;;  %p2090_p6 = scmp.ne.s32.totalorder %s2086_s27, 0 }
 0x362   : > { %p2091_p13 = scmp.ge.s32.totalorder %s1682_s17, 2  ;;  %s1351_s4 = scalar_lea.sflag [#allocation6], %s1350_s30 }
 0x364   : > { %p1503_p2 = pnand %p2091_p13, %p2090_p6 }
 0x366   : > { %1657 = dma.done.wait (!%p1503_p2), %s1351_s4, 16  }
 0x367   : > { %1659 = vsyncadd (!%p1503_p2), %s1351_s4, 4294967280  ;;  %s19_s17 = sadd.s32 1, %s1682_s17   ;;  %s2092_s12 = smov %s1666_s13 }
 0x368   : > { %p16_p5 = scmp.ge.s32.totalorder %s19_s17, 4   ;;  %s2093_s13 = smov %s1670_s14 }
 0x369   : > { %s2094_s14 = smov %s1770_s26  ;;  %s2095_s15 = smov %s1678_s16 }
 0x36a   : > { %s2096_s16 = smov %s2098_s20  ;;  %18 = sbr.rel (!%p16_p5) target bundleno = 6 (0x6), region = 85 }
 0x371   :  { %1355 = vsyncpa [#allocation5], 1 }
 0x372   :  { %1357 = vsyncpa [#allocation5 + $0x1], 1 }
 0x373   :  { %1358 = vsyncpa [#allocation6], 1 }
 0x374   :  { %1360 = vsyncpa [#allocation6 + $0x1], 1 }

</bundles_post_ra>
